<compile_context>
chip_gen: v5e
topology: v5e:2x2
jax: 0.10.0
libtpu: 0.0.40
codegen_flags: <defaults>
</compile_context>

<pallas_src>
import jax
import jax.numpy as jnp
from jax.experimental import pallas as pl
from jax.experimental.pallas import tpu as pltpu


_VMEM_TARGET_BYTES = 12 * 1024 * 1024   # pipeline working-set target (all gens)
_VMEM_LIMIT_BYTES = 48 * 1024 * 1024    # raised scoped limit; < v7x 64 MiB


def _sublane(dtype) -> int:
    # second-to-last block-dim granularity: 8 (f32), 16 (bf16), 32 (int8/fp8)
    return max(8, 32 // jnp.dtype(dtype).itemsize)


def _pos_add_kernel(x_ref, pe_ref, o_ref):
    # Shapes are either (TL, D) / (TL, D) [3-D path, batch dim squeezed] or
    # (B, TN) / (1, TN) [lane-dense flattened path]; broadcasting covers both.
    # Add in f32, cast at the store.
    o_ref[...] = (x_ref[...].astype(jnp.float32)
                  + pe_ref[...].astype(jnp.float32)).astype(o_ref.dtype)


def positional_encoding_learn(x: jax.Array, embed_weight: jax.Array, *,
                              vmem_target_bytes: int = _VMEM_TARGET_BYTES) -> jax.Array:
    """x: [B, L, D]; embed_weight: [max_len, D]. Returns x + embed_weight[:L]."""
    B, L, D = x.shape
    max_len, d_model = embed_weight.shape
    assert d_model == D, "d_model mismatch"
    assert 1 <= L <= max_len, "sequence length exceeds max_len"

    out_dtype = jnp.promote_types(x.dtype, embed_weight.dtype)
    x_it = jnp.dtype(x.dtype).itemsize
    w_it = jnp.dtype(embed_weight.dtype).itemsize
    o_it = jnp.dtype(out_dtype).itemsize

    if D >= 128:
        # ---------------- 3-D path: grid = (L_tiles, B), batch innermost ----
        sub = max(_sublane(x.dtype), _sublane(embed_weight.dtype))
        # double-buffered x, out and pe tiles per grid step
        per_row = D * (2 * x_it + 2 * o_it + 2 * w_it)
        cap = max(sub, (vmem_target_bytes // per_row) // sub * sub)
        # Always slice the table to the first L rows (tiny, XLA copy at most
        # L*D bytes) so x and pe share the same ragged last tile and no rows
        # past L are ever read.
        pe_arr = embed_weight[:L]
        if L <= cap:
            # single L tile; block equals the full (L, D) dims -> no
            # multiple-of-sublane constraint on arbitrary L.
            tl = L
        else:
            tl = cap                      # multiple of `sub`; ragged last tile masked
        grid_l = pl.cdiv(L, tl)

        return pl.pallas_call(
            _pos_add_kernel,
            out_shape=jax.ShapeDtypeStruct((B, L, D), out_dtype),
            grid=(grid_l, B),
            in_specs=[
                # x: one (TL, D) slab of one batch row per step (batch squeezed)
                pl.BlockSpec((None, tl, D), lambda l, b: (b, l, 0)),
                # pe: independent of b -> not re-DMA'd while the inner (batch)
                # grid axis varies; streamed once per L-tile.
                pl.BlockSpec((tl, D), lambda l, b: (l, 0)),
            ],
            out_specs=pl.BlockSpec((None, tl, D), lambda l, b: (b, l, 0)),
            compiler_params=pltpu.CompilerParams(
                dimension_semantics=("parallel", "parallel"),
                vmem_limit_bytes=_VMEM_LIMIT_BYTES,
            ),
        )(x, pe_arr)

    # ---------------- lane-dense flattened path (D < 128) -------------------
    n = L * D
    xf = x.reshape(B, n)                          # free (contiguous) reshape
    pef = embed_weight[:L].reshape(1, n)          # tiny slice (D < 128)
    per_col = 2 * B * (x_it + o_it) + 2 * w_it    # double-buffered x, out, pe
    cap = max(128, (vmem_target_bytes // per_col) // 128 * 128)
    tn = n if n <= cap else cap                   # full dim or multiple of 128
    grid_n = pl.cdiv(n, tn)

    out = pl.pallas_call(
        _pos_add_kernel,
        out_shape=jax.ShapeDtypeStruct((B, n), out_dtype),
        grid=(grid_n,),
        in_specs=[
            pl.BlockSpec((B, tn), lambda i: (0, i)),   # x slab, lane-dense
            pl.BlockSpec((1, tn), lambda i: (0, i)),   # pe, broadcast over batch
        ],
        out_specs=pl.BlockSpec((B, tn), lambda i: (0, i)),
        compiler_params=pltpu.CompilerParams(
            dimension_semantics=("parallel",),
            vmem_limit_bytes=_VMEM_LIMIT_BYTES,
        ),
    )(xf, pef)
    return out.reshape(B, L, D)


def reference(x, embed_weight):
    L = x.shape[1]
    out_dtype = jnp.promote_types(x.dtype, embed_weight.dtype)
    return (x.astype(jnp.float32)
            + embed_weight[:L].astype(jnp.float32)[None, :, :]).astype(out_dtype)


if __name__ == "__main__":
    key = jax.random.PRNGKey(0)
    kx, kw, kx2, kw2, kx3, kw3 = jax.random.split(key, 6)

    # 1) Small shapes matching the module's forward (exercises the lane-dense
    #    D < 128 path): x = [B=2, L=8, D=32], table = [max_len=64, 32].
    B, L, D, max_len = 2, 8, 32, 64
    x = jax.random.normal(kx, (B, L, D), dtype=jnp.float32)
    w = jax.random.uniform(kw, (max_len, D), dtype=jnp.float32)  # nn.init.uniform_
    out = jax.block_until_ready(positional_encoding_learn(x, w))
    assert out.shape == (B, L, D)
    assert jnp.allclose(out, reference(x, w), atol=1e-6, rtol=1e-6)

    # 2) D >= 128, single L tile: exercises the 3-D grid=(L_tiles, B) path.
    B2, L2, D2, max_len2 = 2, 16, 128, 64
    x2 = jax.random.normal(kx2, (B2, L2, D2), dtype=jnp.float32)
    w2 = jax.random.uniform(kw2, (max_len2, D2), dtype=jnp.float32)
    out2 = jax.block_until_ready(positional_encoding_learn(x2, w2))
    assert jnp.allclose(out2, reference(x2, w2), atol=1e-6, rtol=1e-6)

    # 3) Tiny VMEM target forces multiple L tiles (TL=8, grid=(4, 2)):
    #    exercises the pipelined, table-streamed-once-per-tile structure,
    #    including a ragged last L tile (L=30 not a multiple of 8).
    B3, L3, D3, max_len3 = 2, 30, 128, 64
    x3 = jax.random.normal(kx3, (B3, L3, D3), dtype=jnp.float32)
    w3 = jax.random.uniform(kw3, (max_len3, D3), dtype=jnp.float32)
    out3 = jax.block_until_ready(
        positional_encoding_learn(x3, w3, vmem_target_bytes=16 * 1024))
    assert jnp.allclose(out3, reference(x3, w3), atol=1e-6, rtol=1e-6)

    print("KERNEL_OK")
</pallas_src>

<mosaic_0001>
module attributes {stable_mosaic.version = 11 : i64} {
  func.func @_pos_add_kernel(%arg0: i32, %arg1: memref<2x256xf32, #tpu.memory_space<vmem>>, %arg2: memref<1x256xf32, #tpu.memory_space<vmem>>, %arg3: memref<2x256xf32, #tpu.memory_space<vmem>>) attributes {dimension_semantics = [#tpu.dimension_semantics<parallel>], iteration_bounds = array<i64: 1>, scalar_prefetch = 0 : i64, scratch_operands = 0 : i64, tpu.core_type = #tpu.core_type<tc>, window_params = [{transform_indices = @transform_0, window_bounds = array<i64: 2, 256>}, {transform_indices = @transform_1, window_bounds = array<i64: 1, 256>}, {transform_indices = @transform_2, window_bounds = array<i64: 2, 256>}]} {
    %c0 = arith.constant 0 : index
    %c0_0 = arith.constant 0 : index
    %0 = vector.load %arg1[%c0, %c0_0] : memref<2x256xf32, #tpu.memory_space<vmem>>, vector<2x256xf32>
    %c0_1 = arith.constant 0 : index
    %c0_2 = arith.constant 0 : index
    %1 = vector.load %arg2[%c0_1, %c0_2] : memref<1x256xf32, #tpu.memory_space<vmem>>, vector<1x256xf32>
    %2 = vector.broadcast %1 : vector<1x256xf32> to vector<2x256xf32>
    %3 = arith.addf %0, %2 : vector<2x256xf32>
    %c0_3 = arith.constant 0 : index
    %c0_4 = arith.constant 0 : index
    %4 = vector.load %arg3[%c0_3, %c0_4] : memref<2x256xf32, #tpu.memory_space<vmem>>, vector<2x256xf32>
    tpu.vector_store %arg3[%c0_3, %c0_4], %3 {strides = array<i32>} : memref<2x256xf32, #tpu.memory_space<vmem>>, vector<2x256xf32>,
    return
  }
  func.func @transform_0(%arg0: i32) -> (i32, i32) {
    %c0_i32 = arith.constant 0 : i32
    %c0_i32_0 = arith.constant 0 : i32
    return %c0_i32, %arg0 : i32, i32
  }
  func.func @transform_1(%arg0: i32) -> (i32, i32) {
    %c0_i32 = arith.constant 0 : i32
    %c0_i32_0 = arith.constant 0 : i32
    return %c0_i32, %arg0 : i32, i32
  }
  func.func @transform_2(%arg0: i32) -> (i32, i32) {
    %c0_i32 = arith.constant 0 : i32
    %c0_i32_0 = arith.constant 0 : i32
    return %c0_i32, %arg0 : i32, i32
  }
}

</mosaic_0001>

<bundles_post_ra>
// kernel: tpu_custom_call.1
= control target key start
LH: loop header
LB: loop body
LE: loop exit
PB: predicated region body
PF: predicated region fallthrough
CT: control target
= control target key end

     0   :  { %7 = vsyncpa [#allocation3], 0  ;;  %s177_s0 = inlined_call_operand.hbm [shape: f32[2,256], index: 0, kind: input, shape index: {}]   ;;  %s178_s1 = inlined_call_operand.hbm [shape: f32[1,256], index: 1, kind: input, shape index: {}]   ;;  %s179_s2 = inlined_call_operand.hbm [shape: f32[2,256], index: 2, kind: output, shape index: {}]  }
   0x1   :  { %8 = vsyncpa [#allocation6], 0 }
   0x2   :  { %9 = vsyncpa [#allocation4], 0  ;;  %s15_s11 = sshll.u32 %s177_s0, 4  ;;  %s150_s12 = smov [#allocation2]   ;;  %s16_s11 = int_to_ptr.hbm [resolvable:$true] %s15_s11 }
   0x3   :  { %s17_s13 = sshll.u32 %s150_s12, 4  ;;  %s26_s16 = sshll.u32 %s178_s1, 4  ;;  %s18_s13 = int_to_ptr.vmem [resolvable:$true] %s17_s13  ;;  %s27_s16 = int_to_ptr.hbm [resolvable:$true] %s26_s16 }
   0x4   :  { %20 = dma.hbm_to_vmem [thread:$0]  %s16_s11, 64, %s18_s13, [#allocation3]  }
   0x5   :  { %s151_s17 = smov [#allocation5]  }
   0x6   :  { %s28_s18 = sshll.u32 %s151_s17, 4  ;;  %s29_s18 = int_to_ptr.vmem [resolvable:$true] %s28_s18 }
   0x7   :  { %31 = dma.hbm_to_vmem [thread:$0]  %s27_s16, 32, %s29_s18, [#allocation6]  }
   0x8   :  { %144 = dma.done.wait [#allocation3], 64  }
   0x9   :  { %145 = vsyncadd [#allocation3], 4294967232 }
   0xa   :  { %146 = dma.done.wait [#allocation6], 32  }
   0xb   :  { %147 = vsyncadd [#allocation6], 4294967264  ;;  %v41_v0 = vld [vmem:[#allocation5] sm:$0x3]  ;;  %vm46_vm0 = vcmask 1041408   ;;  %s152_s0 = smov [#allocation7]  }
   0xc   :  { %v43_v1 = vperm.slane %v41_v0, 0  ;;  %v44_v2 = vperm.slane %v41_v0, 1  ;;  %v40_v3 = vld [vmem:[#allocation2] sm:$0xf]  ;;  %s56_s19 = sshll.u32 %s152_s0, 4  ;;  %s58_s21 = sshll.u32 %s179_s2, 4  ;;  %s57_s19 = int_to_ptr.vmem [resolvable:$true] %s56_s19  ;;  %s59_s21 = int_to_ptr.hbm [resolvable:$true] %s58_s21 }
   0xe   :  { %v45_v4 = vrot.slane %v44_v2, 6 }
  0x10   :  { %v47_v5 = vsel %vm46_vm0, %v43_v1, %v45_v4 }
  0x11   :  { %v49_v6 = vadd.f32 %v47_v5, %v40_v3 }
  0x13   :  { %50 = vst [vmem:[#allocation7] sm:$0xf] %v49_v6 }
  0x14   :  { %61 = dma.vmem_to_hbm [thread:$0]  %s57_s19, 64, %s59_s21, [#allocation4]  }
  0x15   :  { %148 = dma.done.wait [#allocation4], 64  }
  0x16   :  { %149 = vsyncadd [#allocation4], 4294967232 }
  0x17   :  { %66 = vsyncpa [#allocation3], 1 }
  0x18   :  { %67 = vsyncpa [#allocation6], 1 }
  0x19   :  { %68 = vsyncpa [#allocation4], 1 }

</bundles_post_ra>
